<compile_context>
chip_gen: v6e
topology: v6e:2x2x1
jax: 0.10.0
libtpu: 0.0.40
codegen_flags: <defaults>
</compile_context>

<pallas_src>
import functools
import math

import jax
import jax.numpy as jnp
from jax.experimental import pallas as pl
from jax.experimental.pallas import tpu as pltpu


def _attn_layer_kernel(x_ref, wt_ref, b_ref, o_ref, m_scr, l_scr, acc_scr, *,
                       compute_dtype, seq_len, block_l):
    # x_ref   : (TB, TL, H)  current batch/sequence tile, storage dtype
    # wt_ref  : (H, C)       pre-transposed linear weight (compute dtype)
    # b_ref   : (1, C)       bias, f32
    # o_ref   : (TB, C, H)   output tile (revisited across the L-tile axis)
    # m_scr/l_scr : (TB, 1, C) f32 running max / running sum
    # acc_scr     : (TB, C, H) f32 output accumulator
    li = pl.program_id(1)

    @pl.when(li == 0)
    def _init():
        m_scr[...] = jnp.full_like(m_scr, -jnp.inf)
        l_scr[...] = jnp.zeros_like(l_scr)
        acc_scr[...] = jnp.zeros_like(acc_scr)

    x_t = x_ref[...]
    if compute_dtype is not None:
        # In-kernel cast: only the MXU operands are narrowed; no extra HBM
        # read/write pass over x in the wrapper.
        x_t = x_t.astype(compute_dtype)

    tb, tl, h = x_t.shape
    ragged = (seq_len % block_l) != 0
    if ragged:
        # The last L tile extends past the sequence: zero the invalid rows of
        # x and pin their logits to -inf so they contribute exactly nothing.
        pos = li * block_l + jax.lax.broadcasted_iota(jnp.int32, (1, tl, 1), 1)
        valid = pos < seq_len                                   # (1, TL, 1)
        x_t = jnp.where(valid, x_t, jnp.zeros((), x_t.dtype))

    # Folded first matmul: one (TB*TL, H) @ (H, C) dot for the whole tile,
    # bias added as a (1, C) row (sublane broadcast) before any transpose.
    logits = jnp.dot(x_t.reshape(tb * tl, h), wt_ref[...],
                     preferred_element_type=jnp.float32)
    logits = logits + b_ref[...]                                # (TB*TL, C)
    s = logits.reshape(tb, tl, -1)                              # (TB, TL, C)
    if ragged:
        s = jnp.where(valid, s, -jnp.inf)

    # Online softmax over the sequence axis (axis=1), f32 statistics.
    m_prev = m_scr[...]                                         # (TB, 1, C)
    m_new = jnp.maximum(m_prev, jnp.max(s, axis=1, keepdims=True))
    alpha = jnp.exp(m_prev - m_new)                             # (TB, 1, C)
    p = jnp.exp(s - m_new)                                      # (TB, TL, C)
    l_scr[...] = alpha * l_scr[...] + jnp.sum(p, axis=1, keepdims=True)

    # Second matmul, batched over TB: (TB, C, H) = 'btc,bth->bch'.
    contrib = jax.lax.dot_general(
        p.astype(x_t.dtype), x_t,
        dimension_numbers=(((1,), (1,)), ((0,), (0,))),
        preferred_element_type=jnp.float32)
    acc_scr[...] = jnp.swapaxes(alpha, 1, 2) * acc_scr[...] + contrib
    m_scr[...] = m_new

    @pl.when(li == pl.num_programs(1) - 1)
    def _finalize():
        denom = jnp.swapaxes(l_scr[...], 1, 2)                  # (TB, C, 1)
        o_ref[...] = (acc_scr[...] / denom).astype(o_ref.dtype)


def _round_up(n, m):
    return ((n + m - 1) // m) * m


def _largest_divisor(n, cap):
    d = max(1, min(n, cap))
    while n % d:
        d -= 1
    return d


def attn_layer_forward(x, w, b, *, compute_dtype=None, block_b=8, block_l=512,
                       x_buffer_count=None):
    """x: (B, L, H), w: (C, H), b: (C,) -> (B, C, H)."""
    B, L, H = x.shape
    C = w.shape[0]
    out_dtype = x.dtype
    param_dtype = compute_dtype if compute_dtype is not None else x.dtype

    # Tiny parameters: pre-transpose / cast in the wrapper (negligible bytes).
    # x itself is never padded, copied or cast outside the kernel.
    wt = jnp.transpose(w).astype(param_dtype)                  # (H, C)
    bias = b.astype(jnp.float32).reshape(1, C)                 # (1, C)

    # Batch tile: a divisor of B (no batch padding).  Keep >= 2 batch tiles
    # when B >= 2 so the "parallel" axis can shard across v7x's 2 TensorCores.
    tb_cap = max(1, min(block_b, (B + 1) // 2))
    TB = _largest_divisor(B, tb_cap)

    # Sequence tile: multiple of 8; a ragged last tile is masked in-kernel.
    TL = min(_round_up(L, 8), _round_up(block_l, 8))

    def vmem_bytes(tb, tl):
        in_sz = jnp.dtype(x.dtype).itemsize
        cd_sz = jnp.dtype(param_dtype).itemsize
        out_sz = jnp.dtype(out_dtype).itemsize
        c_lanes = _round_up(C, 128)               # lane padding of the C axis
        x_tile = tb * tl * H * in_sz              # double-buffered input
        x_cast = tb * tl * H * cd_sz if cd_sz != in_sz else 0
        interm = 2 * tb * tl * c_lanes * 4        # f32 logits + p
        params = H * C * cd_sz + c_lanes * 4
        out_tile = tb * C * H * out_sz
        scratch = tb * C * H * 4 + 2 * tb * c_lanes * 4
        return 2 * (x_tile + params + out_tile) + x_cast + interm + scratch

    # Fit a conservative working-set budget valid on every generation
    # (v7x has only 64 MiB physical VMEM per TensorCore).
    budget = 40 * 1024 * 1024
    while TL > 8 and vmem_bytes(TB, TL) > budget:
        TL = max(8, _round_up(TL // 2, 8))
    while TB > 1 and vmem_bytes(TB, TL) > budget:
        TB = _largest_divisor(B, TB - 1)

    # Always set the scoped-VMEM limit (v5e default is only 16 MiB) and cap it
    # safely below v7x's 64 MiB physical VMEM.
    vmem_limit = int(min(max(vmem_bytes(TB, TL) * 1.25, 32 * 1024 * 1024),
                         48 * 1024 * 1024))

    grid = (B // TB, pl.cdiv(L, TL))

    x_spec_kwargs = {}
    if x_buffer_count is not None and x_buffer_count > 2:
        # Optional deeper pipelining for x (e.g. pl.Buffered(3) on v7x where
        # per-step DMA is short and issue latency is a larger fraction).
        x_spec_kwargs["pipeline_mode"] = pl.Buffered(x_buffer_count)

    kernel = functools.partial(_attn_layer_kernel,
                               compute_dtype=compute_dtype,
                               seq_len=L, block_l=TL)

    return pl.pallas_call(
        kernel,
        out_shape=jax.ShapeDtypeStruct((B, C, H), out_dtype),
        grid_spec=pltpu.PrefetchScalarGridSpec(
            num_scalar_prefetch=0,
            grid=grid,
            in_specs=[
                pl.BlockSpec((TB, TL, H), lambda bi, li: (bi, li, 0),
                             **x_spec_kwargs),                           # x
                pl.BlockSpec((H, C), lambda bi, li: (0, 0)),             # W^T
                pl.BlockSpec((1, C), lambda bi, li: (0, 0)),             # bias
            ],
            out_specs=pl.BlockSpec((TB, C, H), lambda bi, li: (bi, 0, 0)),
            scratch_shapes=[
                pltpu.VMEM((TB, 1, C), jnp.float32),    # running max
                pltpu.VMEM((TB, 1, C), jnp.float32),    # running sum
                pltpu.VMEM((TB, C, H), jnp.float32),    # output accumulator
            ],
        ),
        compiler_params=pltpu.CompilerParams(
            dimension_semantics=("parallel", "arbitrary"),
            vmem_limit_bytes=vmem_limit,
        ),
    )(x, wt, bias)


def _reference(x, w, b):
    logits = jnp.einsum("blh,ch->blc", x, w) + b                      # (B, L, C)
    attn = jax.nn.softmax(jnp.transpose(logits, (0, 2, 1)), axis=2)   # (B, C, L)
    return jnp.einsum("bcl,blh->bch", attn, x)                        # (B, C, H)


if __name__ == "__main__":
    # Small shapes consistent with the module: batch=2, seq=8, hid=32, classes=4.
    B, L, H, C = 2, 8, 32, 4

    key = jax.random.PRNGKey(0)
    kx, kw, kb = jax.random.split(key, 3)

    x = jax.random.normal(kx, (B, L, H), dtype=jnp.float32)
    bound = 1.0 / math.sqrt(H)   # nn.Linear default init range
    w = jax.random.uniform(kw, (C, H), minval=-bound, maxval=bound, dtype=jnp.float32)
    b = jax.random.uniform(kb, (C,), minval=-bound, maxval=bound, dtype=jnp.float32)

    ref = _reference(x, w, b)

    out = jax.block_until_ready(attn_layer_forward(x, w, b))
    assert out.shape == (B, C, H)
    assert jnp.allclose(out, ref, atol=1e-3, rtol=1e-3), "pallas/ref mismatch"

    # NOTE: the bf16-MXU path (compute_dtype=jnp.bfloat16, cast done in-kernel)
    # is available for bandwidth-bound deployments (especially v5e) but is not
    # exercised here: the interpret/CPU dot backend rejects bf16 x bf16 -> f32.
    print("KERNEL_OK")
</pallas_src>

<mosaic_0001>
module attributes {stable_mosaic.version = 11 : i64} {
  func.func @_attn_layer_kernel(%arg0: i32, %arg1: i32, %arg2: memref<1x8x32xf32, #tpu.memory_space<vmem>>, %arg3: memref<32x4xf32, #tpu.memory_space<vmem>>, %arg4: memref<1x4xf32, #tpu.memory_space<vmem>>, %arg5: memref<1x4x32xf32, #tpu.memory_space<vmem>>, %arg6: memref<1x1x4xf32, #tpu.memory_space<vmem>>, %arg7: memref<1x1x4xf32, #tpu.memory_space<vmem>>, %arg8: memref<1x4x32xf32, #tpu.memory_space<vmem>>) attributes {dimension_semantics = [#tpu.dimension_semantics<parallel>, #tpu.dimension_semantics<arbitrary>], iteration_bounds = array<i64: 2, 1>, scalar_prefetch = 0 : i64, scratch_operands = 3 : i64, tpu.core_type = #tpu.core_type<tc>, window_params = [{transform_indices = @transform_0, window_bounds = array<i64: 1, 8, 32>}, {pipeline_mode = #tpu.pipeline_mode<synchronous>, transform_indices = @transform_1, window_bounds = array<i64: 32, 4>}, {pipeline_mode = #tpu.pipeline_mode<synchronous>, transform_indices = @transform_2, window_bounds = array<i64: 1, 4>}, {transform_indices = @transform_3, window_bounds = array<i64: 1, 4, 32>}]} {
    %c0_i32 = arith.constant 0 : i32
    %0 = arith.cmpi eq, %arg1, %c0_i32 : i32
    %1 = arith.extui %0 : i1 to i32
    %c0_i32_0 = arith.constant 0 : i32
    %2 = arith.cmpi ne, %1, %c0_i32_0 : i32
    scf.if %2 {
      %cst_30 = arith.constant 0xFF800000 : f32
      %37 = vector.broadcast %cst_30 : f32 to vector<1x1x4xf32>
      %c0_31 = arith.constant 0 : index
      %c0_32 = arith.constant 0 : index
      %c0_33 = arith.constant 0 : index
      %38 = vector.load %arg6[%c0_31, %c0_32, %c0_33] : memref<1x1x4xf32, #tpu.memory_space<vmem>>, vector<1x1x4xf32>
      tpu.vector_store %arg6[%c0_31, %c0_32, %c0_33], %37 {strides = array<i32>} : memref<1x1x4xf32, #tpu.memory_space<vmem>>, vector<1x1x4xf32>,
      %cst_34 = arith.constant 0.000000e+00 : f32
      %39 = vector.broadcast %cst_34 : f32 to vector<1x1x4xf32>
      %c0_35 = arith.constant 0 : index
      %c0_36 = arith.constant 0 : index
      %c0_37 = arith.constant 0 : index
      %40 = vector.load %arg7[%c0_35, %c0_36, %c0_37] : memref<1x1x4xf32, #tpu.memory_space<vmem>>, vector<1x1x4xf32>
      tpu.vector_store %arg7[%c0_35, %c0_36, %c0_37], %39 {strides = array<i32>} : memref<1x1x4xf32, #tpu.memory_space<vmem>>, vector<1x1x4xf32>,
      %cst_38 = arith.constant 0.000000e+00 : f32
      %41 = vector.broadcast %cst_38 : f32 to vector<1x4x32xf32>
      %c0_39 = arith.constant 0 : index
      %c0_40 = arith.constant 0 : index
      %c0_41 = arith.constant 0 : index
      %42 = vector.load %arg8[%c0_39, %c0_40, %c0_41] : memref<1x4x32xf32, #tpu.memory_space<vmem>>, vector<1x4x32xf32>
      tpu.vector_store %arg8[%c0_39, %c0_40, %c0_41], %41 {strides = array<i32>} : memref<1x4x32xf32, #tpu.memory_space<vmem>>, vector<1x4x32xf32>,
    } else {
    }
    %c0 = arith.constant 0 : index
    %c0_1 = arith.constant 0 : index
    %c0_2 = arith.constant 0 : index
    %3 = vector.load %arg2[%c0, %c0_1, %c0_2] : memref<1x8x32xf32, #tpu.memory_space<vmem>>, vector<1x8x32xf32>
    %4 = vector.shape_cast %3 : vector<1x8x32xf32> to vector<8x32xf32>
    %c0_3 = arith.constant 0 : index
    %c0_4 = arith.constant 0 : index
    %5 = vector.load %arg3[%c0_3, %c0_4] : memref<32x4xf32, #tpu.memory_space<vmem>>, vector<32x4xf32>
    %cst = arith.constant dense<0.000000e+00> : vector<8x4xf32>
    %6 = tpu.matmul %4, %5, %cst {dimension_numbers = #tpu.dot_dimension_numbers<[1], [0], [0], [1], [0, 0, 1, 1], [], []>} : vector<8x32xf32>, vector<32x4xf32>, vector<8x4xf32> -> vector<8x4xf32>
    %c0_5 = arith.constant 0 : index
    %c0_6 = arith.constant 0 : index
    %7 = vector.load %arg4[%c0_5, %c0_6] : memref<1x4xf32, #tpu.memory_space<vmem>>, vector<1x4xf32>
    %8 = vector.broadcast %7 : vector<1x4xf32> to vector<8x4xf32>
    %9 = arith.addf %6, %8 : vector<8x4xf32>
    %10 = vector.shape_cast %9 : vector<8x4xf32> to vector<1x8x4xf32>
    %c0_7 = arith.constant 0 : index
    %c0_8 = arith.constant 0 : index
    %c0_9 = arith.constant 0 : index
    %11 = vector.load %arg6[%c0_7, %c0_8, %c0_9] : memref<1x1x4xf32, #tpu.memory_space<vmem>>, vector<1x1x4xf32>
    %cst_10 = arith.constant dense<0xFF800000> : vector<1x4xf32>
    %12 = vector.multi_reduction <maximumf>, %10, %cst_10 [1] : vector<1x8x4xf32> to vector<1x4xf32>
    %13 = vector.shape_cast %12 : vector<1x4xf32> to vector<1x1x4xf32>
    %14 = arith.maximumf %11, %13 : vector<1x1x4xf32>
    %15 = arith.subf %11, %14 : vector<1x1x4xf32>
    %16 = math.exp %15 : vector<1x1x4xf32>
    %17 = vector.broadcast %14 : vector<1x1x4xf32> to vector<1x8x4xf32>
    %18 = arith.subf %10, %17 : vector<1x8x4xf32>
    %19 = math.exp %18 : vector<1x8x4xf32>
    %c0_11 = arith.constant 0 : index
    %c0_12 = arith.constant 0 : index
    %c0_13 = arith.constant 0 : index
    %20 = vector.load %arg7[%c0_11, %c0_12, %c0_13] : memref<1x1x4xf32, #tpu.memory_space<vmem>>, vector<1x1x4xf32>
    %21 = arith.mulf %16, %20 : vector<1x1x4xf32>
    %cst_14 = arith.constant dense<0.000000e+00> : vector<1x4xf32>
    %22 = vector.multi_reduction <add>, %19, %cst_14 [1] : vector<1x8x4xf32> to vector<1x4xf32>
    %23 = vector.shape_cast %22 : vector<1x4xf32> to vector<1x1x4xf32>
    %24 = arith.addf %21, %23 : vector<1x1x4xf32>
    %c0_15 = arith.constant 0 : index
    %c0_16 = arith.constant 0 : index
    %c0_17 = arith.constant 0 : index
    %25 = vector.load %arg7[%c0_15, %c0_16, %c0_17] : memref<1x1x4xf32, #tpu.memory_space<vmem>>, vector<1x1x4xf32>
    tpu.vector_store %arg7[%c0_15, %c0_16, %c0_17], %24 {strides = array<i32>} : memref<1x1x4xf32, #tpu.memory_space<vmem>>, vector<1x1x4xf32>,
    %cst_18 = arith.constant dense<0.000000e+00> : vector<1x4x32xf32>
    %26 = tpu.matmul %19, %3, %cst_18 {dimension_numbers = #tpu.dot_dimension_numbers<[1], [1], [2], [2], [0, 0, 0, 2, 1, 2], [0], [0]>} : vector<1x8x4xf32>, vector<1x8x32xf32>, vector<1x4x32xf32> -> vector<1x4x32xf32>
    %27 = tpu.transpose %16, [0, 2, 1] : vector<1x1x4xf32> -> vector<1x4x1xf32>
    %c0_19 = arith.constant 0 : index
    %c0_20 = arith.constant 0 : index
    %c0_21 = arith.constant 0 : index
    %28 = vector.load %arg8[%c0_19, %c0_20, %c0_21] : memref<1x4x32xf32, #tpu.memory_space<vmem>>, vector<1x4x32xf32>
    %29 = vector.broadcast %27 : vector<1x4x1xf32> to vector<1x4x32xf32>
    %30 = arith.mulf %29, %28 : vector<1x4x32xf32>
    %31 = arith.addf %30, %26 : vector<1x4x32xf32>
    %c0_22 = arith.constant 0 : index
    %c0_23 = arith.constant 0 : index
    %c0_24 = arith.constant 0 : index
    %32 = vector.load %arg8[%c0_22, %c0_23, %c0_24] : memref<1x4x32xf32, #tpu.memory_space<vmem>>, vector<1x4x32xf32>
    tpu.vector_store %arg8[%c0_22, %c0_23, %c0_24], %31 {strides = array<i32>} : memref<1x4x32xf32, #tpu.memory_space<vmem>>, vector<1x4x32xf32>,
    %c0_25 = arith.constant 0 : index
    %c0_26 = arith.constant 0 : index
    %c0_27 = arith.constant 0 : index
    %33 = vector.load %arg6[%c0_25, %c0_26, %c0_27] : memref<1x1x4xf32, #tpu.memory_space<vmem>>, vector<1x1x4xf32>
    tpu.vector_store %arg6[%c0_25, %c0_26, %c0_27], %14 {strides = array<i32>} : memref<1x1x4xf32, #tpu.memory_space<vmem>>, vector<1x1x4xf32>,
    %c0_i32_28 = arith.constant 0 : i32
    %34 = arith.cmpi eq, %arg1, %c0_i32_28 : i32
    %35 = arith.extui %34 : i1 to i32
    %c0_i32_29 = arith.constant 0 : i32
    %36 = arith.cmpi ne, %35, %c0_i32_29 : i32
    scf.if %36 {
      %c0_30 = arith.constant 0 : index
      %c0_31 = arith.constant 0 : index
      %c0_32 = arith.constant 0 : index
      %37 = vector.load %arg7[%c0_30, %c0_31, %c0_32] : memref<1x1x4xf32, #tpu.memory_space<vmem>>, vector<1x1x4xf32>
      %38 = tpu.transpose %37, [0, 2, 1] : vector<1x1x4xf32> -> vector<1x4x1xf32>
      %c0_33 = arith.constant 0 : index
      %c0_34 = arith.constant 0 : index
      %c0_35 = arith.constant 0 : index
      %39 = vector.load %arg8[%c0_33, %c0_34, %c0_35] : memref<1x4x32xf32, #tpu.memory_space<vmem>>, vector<1x4x32xf32>
      %40 = vector.broadcast %38 : vector<1x4x1xf32> to vector<1x4x32xf32>
      %41 = arith.divf %39, %40 : vector<1x4x32xf32>
      %c0_36 = arith.constant 0 : index
      %c0_37 = arith.constant 0 : index
      %c0_38 = arith.constant 0 : index
      %42 = vector.load %arg5[%c0_36, %c0_37, %c0_38] : memref<1x4x32xf32, #tpu.memory_space<vmem>>, vector<1x4x32xf32>
      tpu.vector_store %arg5[%c0_36, %c0_37, %c0_38], %41 {strides = array<i32>} : memref<1x4x32xf32, #tpu.memory_space<vmem>>, vector<1x4x32xf32>,
    } else {
    }
    return
  }
  func.func @transform_0(%arg0: i32, %arg1: i32) -> (i32, i32, i32) {
    %c0_i32 = arith.constant 0 : i32
    %c0_i32_0 = arith.constant 0 : i32
    return %arg0, %arg1, %c0_i32 : i32, i32, i32
  }
  func.func @transform_1(%arg0: i32, %arg1: i32) -> (i32, i32) {
    %c0_i32 = arith.constant 0 : i32
    %c0_i32_0 = arith.constant 0 : i32
    %c0_i32_1 = arith.constant 0 : i32
    return %c0_i32, %c0_i32_0 : i32, i32
  }
  func.func @transform_2(%arg0: i32, %arg1: i32) -> (i32, i32) {
    %c0_i32 = arith.constant 0 : i32
    %c0_i32_0 = arith.constant 0 : i32
    %c0_i32_1 = arith.constant 0 : i32
    return %c0_i32, %c0_i32_0 : i32, i32
  }
  func.func @transform_3(%arg0: i32, %arg1: i32) -> (i32, i32, i32) {
    %c0_i32 = arith.constant 0 : i32
    %c0_i32_0 = arith.constant 0 : i32
    %c0_i32_1 = arith.constant 0 : i32
    return %arg0, %c0_i32, %c0_i32_0 : i32, i32, i32
  }
}

</mosaic_0001>

<bundles_post_ra>
// kernel: tpu_custom_call.1
= control target key start
LH: loop header
LB: loop body
LE: loop exit
PB: predicated region body
PF: predicated region fallthrough
CT: control target
= control target key end

     0   :  { %8 = vsyncpa [#allocation6], 0  ;;  %s935_s0 = inlined_call_operand.vmem [shape: f32[2,8,32], index: 0, kind: input, shape index: {}]   ;;  %s936_s1 = inlined_call_operand.vmem [shape: f32[32,4], index: 1, kind: input, shape index: {}]   ;;  %s937_s2 = inlined_call_operand.vmem [shape: f32[1,4], index: 2, kind: input, shape index: {}]   ;;  %s938_s3 = inlined_call_operand.hbm [shape: f32[2,4,32], index: 3, kind: output, shape index: {}]  }
   0x1   :  { %10 = vsyncpa [#allocation6 + $0x1], 0  ;;  %s803_s12 = smov 0   ;;  %s805_s13 = smov 0  }
   0x2   :  { %s807_s14 = smov 0   ;;  %s809_s15 = smov 0  }
   0x3   :  { %s811_s16 = smov 0   ;;  %s813_s17 = smov 0  }
   0x4 LB: > { %s596_s18 = sadd.s32 4294967295, %s776_s17   ;;  %s597_s19 = sadd.s32 4294967294, %s776_s17   ;;  %s776_s17 = sphi %s813_s17, %s16_s17   ;;  %s772_s16 = sphi %s811_s16, %s945_s16   ;;  %s768_s15 = sphi %s809_s15, %s944_s15   ;;  %s764_s14 = sphi %s807_s14, %s943_s14   ;;  %s760_s13 = sphi %s805_s13, %s942_s13   ;;  %s756_s12 = sphi %s803_s12, %s941_s12  }
   0x5   : > { %s28_s20 = sadd.s32 1, %s772_s16  ;;  %s105_s21 = sadd.s32 1, %s764_s14 }
   0x6   : > { %p30_p0 = scmp.ge.s32.totalorder %s28_s20, 2  ;;  %p115_p1 = scmp.ne.s32.totalorder %s764_s14, %s760_s13 }
   0x7   : > { %p116_p2 = scmp.eq.s32.totalorder %s596_s18, 1  ;;  %p121_p3 = scmp.ne.s32.totalorder %s760_s13, %s756_s12 }
   0x8   : > { %s947_s20 = smov (%p30_p0, %s28_s20), 0  ;;  %p122_p5 = scmp.eq.s32.totalorder %s597_s19, 1 }
   0x9   : > { %p843_p4 = por %p116_p2, %p115_p1  ;;  %s102_s23 = ssub.s32 %s772_s16, %s947_s20 }
   0xa   : > { %p600_p6 = scmp.ge.s32.totalorder %s776_s17, 1  ;;  %p103_p7 = scmp.eq.s32.totalorder %s102_s23, 0 }
   0xb   : > { %p850_p8 = por %p122_p5, %p121_p3  ;;  %p156_p9 = scmp.lt.s32.totalorder %s776_s17, 3 }
   0xc   : > { %s856_s25 = scalar_select %p103_p7, %s764_s14, %s105_s21  }
   0xd   : > { %p157_p10 = pnand %p600_p6, %p156_p9 }
   0xe   : > { %p182_p11 = scmp.lt.s32.totalorder (!%p157_p10), %s768_s15, 1  ;;  %s179_s21 = sand.u32 (!%p157_p10), 1, %s760_s13  }
   0xf   : > { %160 = sbr.rel (%p157_p10) target bundleno = 602 (0x25a), region = 32  ;;  %s601_s23 = sshll.u32 (!%p157_p10), %s179_s21, 2 }
  0x10   : > { %s607_s26 = sshll.u32 (!%p157_p10), %s768_s15, 6  ;;  %s181_s27 = scalar_lea.vmem (!%p157_p10), [#allocation5], %s601_s23 }
  0x11   : > { %s526_s28 = sshll.u32 (!%p157_p10), %s181_s27, 4  ;;  %s524_s4 = scalar_lea.hbm (!%p157_p10), %s938_s3, %s607_s26  ;;  %s527_s28 = int_to_ptr.vmem [resolvable:$true] %s526_s28 }
  0x12   : > { %s513_s5 = scalar_lea.sflag (!%p157_p10), [#allocation6], %s179_s21  ;;  %s782_s7 = smov (!%p157_p10), [#allocation5]  }
  0x13   : > { %s704_s8 = sshll.u32 (!%p157_p10), %s782_s7, 4  ;;  %s705_s8 = int_to_ptr.vmem [resolvable:$false] %s704_s8 }
  0x14   : > { %v202_v0 = vld [vmem:[%s936_s1 + $0x18] sm:$0xff]  ;;  %v778_v1 = vmov 0.0   ;;  %v201_v2 = vld [vmem:[%s936_s1 + $0x10] sm:$0xff]  ;;  %vm779_vm0 = vmmov 0   ;;  %vm193_vm1 = vcmask 24576   ;;  %s183_s30 = scalar_select %p182_p11, %s768_s15, 1  ;;  %v298_v14 = vlaneseq }
  0x15   : > { %617 = vmatprep.subr.mxu0 %v778_v1  ;;  %625 = vmatprep.mubr.msk.f32.mxu0 %vm779_vm0, %v778_v1  ;;  %v780_v3 = vmov -inf   ;;  %195 = vst.msk [vmem:[#allocation3] sm:$0x1] %vm193_vm1, %v778_v1  ;;  %v200_v4 = vld [vmem:[%s936_s1 + $0x8] sm:$0xff]  ;;  %v199_v5 = vld [vmem:[%s936_s1] sm:$0xff]  ;;  %vm210_vm2 = vcmask 261120   ;;  %p707_p1 = scmp.lt.s32.totalorder %s527_s28, %s705_s8 }
  0x16   : > { %618 = vmatpush3.msra.mxu0 %v202_v0  ;;  %194 = vst.msk [vmem:[#allocation2] sm:$0x1] %vm193_vm1, %v780_v3  ;;  %628 = vmatprep.subr.mxu1 %v778_v1  ;;  %s602_s6 = sshll.u32 %s183_s30, 3  ;;  %v603_v7 = vld [vmem:[%s937_s2] ss:$0 sm:$0xff]  ;;  %vm285_vm3 = vcmask 31744  }
  0x17   : > { %619 = vmatprep.subr.mxu0 %v778_v1  ;;  %630 = vmatprep.mubr.msk.f32.mxu1 %vm779_vm0, %v778_v1  ;;  %s188_s11 = scalar_lea.vmem %s935_s0, %s602_s6  ;;  %v299_v17 = vshrl.u32 %v298_v14, 7  ;;  %v781_v41 = vmov 0   ;;  %vm350_vm4 = vcmask 64512   ;;  %vm196_vm5 = vcmask 257024   ;;  %s700_s6 = scalar_lea.vmem %s527_s28, 64 }
  0x18   : > { %620 = vmatpush3.msra.mxu0 %v201_v2  ;;  %v198_v6 = vld [vmem:[%s188_s11] sm:$0xff]  ;;  %197 = vst.msk [vmem:[#allocation4] sm:$0xf] %vm196_vm5, %v778_v1  ;;  %p701_p12 = scmp.ne.s32.totalorder %s527_s28, %s700_s6  ;;  %s706_s15 = scalar_lea.vmem %s705_s8, 128 }
  0x19   : > { %621 = vmatprep.subr.mxu0 %v778_v1  ;;  %629 = vmatpush3.msra.mxu1 %v198_v6  ;;  %v300_v21 = vsub.s32 0, %v299_v17  ;;  %p708_p2 = scmp.lt.s32.totalorder %s706_s15, %s700_s6 }
  0x1a   : > { %622 = vmatpush3.msra.mxu0 %v200_v4  ;;  %p702_p13 = pnand %p701_p12, %p843_p4 }
  0x1b   : > { %623 = vmatprep.subr.mxu0 %v778_v1  ;;  %p709_p3 = por %p708_p2, %p707_p1 }
  0x1c   : > { %624 = vmatpush3.msra.mxu0 %v199_v5  ;;  %v306_v35 = vld [vmem:[#allocation3] sm:$0x1]  ;;  %p703_p0 = pneg %p702_p13 }
  0x1d   : > { %626 = vmatmul.mubr.msk.f32.vlgmr.msra.gmra.mxu0 %vm210_vm2, %v198_v6  ;;  %v284_v19 = vld [vmem:[#allocation2] sm:$0x1] }
  0x1e   : > { %p710_p5 = pnand %p709_p3, %p703_p0 }
  0x1f   : > { %v456_v46 = vld [vmem:[#allocation4] sm:$0xf] }
  0xdd   : > { %v280_v8 = vpop.f32.mrf.mxu0 }
  0xde   : > { %v281_v9 = vadd.f32 %v603_v7, %v280_v8 }
  0xdf   : > { %v627_v10 = vpop.f32.mrf.mxu0 }
  0xe0   : > { %v286_v11 = vsel %vm285_vm3, %v281_v9, -inf }
  0xe1   : > { %v287_v12 = vrot.slane %v286_v11, 4 }
  0xe3   : > { %v288_v13 = vmax.f32 %v286_v11, %v287_v12 }
  0xe5   : > { %v289_v15 = vrot.slane %v288_v13, 2 }
  0xe7   : > { %v290_v16 = vmax.f32 %v288_v13, %v289_v15 }
  0xe9   : > { %v291_v18 = vrot.slane %v290_v16, 1 }
  0xeb   : > { %v292_v20 = vmax.f32 %v290_v16, %v291_v18 }
  0xed   : > { %v293_v22 = vmax.f32 %v284_v19, %v292_v20 }
  0xef   : > { %v294_v23 = vsub.f32 %v284_v19, %v293_v22  ;;  %v301_v24 = vrot.slane %v293_v22, %v300_v21  ;;  %466 = vst.msk [vmem:[#allocation2] sm:$0x1] %vm193_vm1, %v293_v22 }
  0xf1   : > { %v295_v25 = vmul.f32 1.442695, %v294_v23  ;;  %v303_v26 = vsub.f32 %v281_v9, %v301_v24 }
  0xf3   : > { %694 = vpow2.f32 %v295_v25  ;;  %v304_v27 = vmul.f32 1.442695, %v303_v26 }
  0xf5   : > { %696 = vpow2.f32 %v304_v27 }
 0x100   : > { %v695_v28 = vpop.eup %694 }
 0x101   : > { %424 = vxpose.xlu1.b32.start.end [1/1] (short) (narrow) %v695_v28, 8  ;;  %v307_v37 = vmul.f32 %v695_v28, %v306_v35 }
 0x102   : > { %v697_v29 = vpop.eup %696 }
 0x103   : > { %v308_v30 = vsel %vm285_vm3, %v697_v29, 0.0  ;;  %318 = vxpose.xlu0.b32.start.end [1/1] (short) (narrow) %v697_v29, 8 }
 0x104   : > { %v309_v31 = vrot.slane %v308_v30, 4 }
 0x106   : > { %v310_v32 = vadd.f32 %v309_v31, %v308_v30 }
 0x108   : > { %v311_v33 = vrot.slane %v310_v32, 2 }
 0x10a   : > { %v312_v34 = vadd.f32 %v311_v33, %v310_v32 }
 0x10c   : > { %v313_v36 = vrot.slane %v312_v34, 1 }
 0x10e   : > { %v314_v38 = vadd.f32 %v313_v36, %v312_v34 }
 0x110   : > { %v315_v39 = vadd.f32 %v314_v38, %v307_v37 }
 0x112   : > { %317 = vst.msk [vmem:[#allocation3] sm:$0x1] %vm193_vm1, %v315_v39 }
 0x119   : > { %v470_v40 = vld [vmem:[#allocation3] sm:$0x1] }
 0x11a   : > { %471 = vxpose.xlu0.b32.start.end [1/1] (short) (narrow) %v470_v40, 8 }
 0x11f   : > { %692 = vset.pattern.permute.xlu1 %v781_v41 }
 0x143   : > { %693 = vset.pattern.permute.xlu0 %v781_v41 }
 0x17d   : > { %v440_v42 = vpop.trf.xlu1 }
 0x17e   : > { %459 = vperm.xlu0 %693, %v440_v42  }
 0x17f   : > { %v334_v43 = vpop.trf.xlu0 }
 0x180   : > { %631 = vmatmul.mubr.msk.f32.vlgmr.msra.gmra.mxu1 %vm350_vm4, %v334_v43 }
 0x196   : > { %v487_v44 = vpop.trf.xlu0 }
 0x197   : > { %506 = vperm.xlu1 %692, %v487_v44  }
 0x1f9   : > { %v460_v47 = vpop.permute.xlu0 %459 }
 0x1fa   : > { %v462_v48 = vmul.f32 %v460_v47, %v456_v46 }
 0x212   : > { %v507_v45 = vpop.permute.xlu1 %506 }
 0x213   : > { %698 = vrcp.f32 %v507_v45 }
 0x220   : > { %v699_v52 = vpop.eup %698 }
 0x240   : > { %v420_v49 = vpop.f32.mrf.mxu1 }
 0x241   : > { %v463_v50 = vadd.f32 %v462_v48, %v420_v49 }
 0x242   : > { %v632_v51 = vpop.f32.mrf.mxu1 }
 0x243   : > { %465 = vst.msk [vmem:[#allocation4] sm:$0xf] %vm196_vm5, %v463_v50 }
 0x24a   : > { %v503_v53 = vld [vmem:[#allocation4] sm:$0xf] }
 0x24b   : > { %v510_v54 = vmul.f32 %v699_v52, %v503_v53 }
 0x24d   : > { %511 = vst.msk [vmem:[%s181_s27] sm:$0xf] %vm196_vm5, %v510_v54 }
 0x24e   : > { %713 = shalt.err (!%p710_p5)
}
 0x24f   : > { %s714_s9 = scalar_lea.hbm %s524_s4, 64  ;;  %s718_s18 = scalar_lea.hbm %s938_s3, 128 }
 0x250   : > { %p715_p6 = scmp.ne.s32.totalorder %s524_s4, %s714_s9  ;;  %p719_p10 = scmp.lt.s32.totalorder %s524_s4, %s938_s3 }
 0x251   : > { %p720_p11 = scmp.lt.s32.totalorder %s718_s18, %s714_s9 }
 0x252   : > { %p716_p7 = pnand %p715_p6, %p843_p4 }
 0x253   : > { %p721_p12 = por %p720_p11, %p719_p10 }
 0x254   : > { %p717_p9 = pneg %p716_p7 }
 0x256   : > { %p722_p13 = pnand %p721_p12, %p717_p9 }
 0x258   : > { %725 = shalt.err (!%p722_p13)
}
 0x259   : > { %633 = dma.vmem_to_hbm [thread:$0]  (%p843_p4), %s527_s28, 64, %s524_s4, %s513_s5  }
 0x25a PF: > { %p639_p0 = scmp.ge.s32.totalorder %s776_s17, 2  ;;  %s538_s23 = sand.u32 1, %s756_s12  }
 0x25b   : > { %s539_s26 = scalar_lea.sflag [#allocation6], %s538_s23 }
 0x25c   : > { %p636_p1 = pnand %p639_p0, %p850_p8 }
 0x25e   : > { %p637_p2 = pneg %p636_p1 }
 0x260   : > { %751 = dma.done.wait (%p637_p2), %s539_s26, 64  }
 0x261   : > { %753 = vsyncadd (%p637_p2), %s539_s26, 4294967232  ;;  %s16_s17 = sadd.s32 1, %s776_s17   ;;  %s941_s12 = smov %s760_s13 }
 0x262   : > { %p13_p3 = scmp.ge.s32.totalorder %s16_s17, 4   ;;  %s942_s13 = smov %s764_s14 }
 0x263   : > { %s943_s14 = smov %s856_s25  ;;  %s944_s15 = smov %s772_s16 }
 0x264   : > { %s945_s16 = smov %s947_s20  ;;  %15 = sbr.rel (!%p13_p3) target bundleno = 4 (0x4), region = 75 }
 0x269   :  { %544 = vsyncpa [#allocation6], 1 }
 0x26a   :  { %546 = vsyncpa [#allocation6 + $0x1], 1 }

</bundles_post_ra>
